<compile_context>
chip_gen: v6e
topology: v6e:2x2x1
jax: 0.10.0
libtpu: 0.0.40
codegen_flags: <defaults>
</compile_context>

<pallas_src>
import functools

import jax
import jax.numpy as jnp
from jax import lax
from jax.experimental import pallas as pl
from jax.experimental.pallas import tpu as pltpu

_LANE = 128
_SUB = 8
_MAX_BLOCK_ROWS = 2048   # (2048,128) f32 = 1 MiB/input tile; 2 inputs x 2 bufs ~ 4 MiB VMEM


def _round_up(v, m):
    return -(-v // m) * m


def _min_sublanes(dtype):
    # f32 min tile is (8,128); sub-32-bit dtypes pack along sublanes
    # (bf16 -> (16,128), int8/bool -> (32,128)).
    itemsize = jnp.dtype(dtype).itemsize
    return _SUB * max(1, 4 // itemsize)


def _focal_kernel(x_ref, y_ref, out_ref, *, gamma, alpha, pos_weight,
                  block_rows, rows_in_last, ragged_last):
    x = x_ref[...].astype(jnp.float32)
    y = y_ref[...].astype(jnp.float32)

    # --- BCE-with-logits (numerically stable) -------------------------------
    # softplus(-x) = log(1 + exp(-x)) = max(-x, 0) + log1p(exp(-|x|))
    e = jnp.exp(-jnp.abs(x))                          # EUP exp (the only exp)
    sp_neg_x = jnp.maximum(-x, 0.0) + jnp.log1p(e)    # EUP log1p
    if pos_weight == 1.0:                             # trace-time specialization
        bce = (1.0 - y) * x + sp_neg_x
    else:
        bce = (1.0 - y) * x + (pos_weight * y + (1.0 - y)) * sp_neg_x

    # --- (1 - pt) without a second exp ---------------------------------------
    # sigmoid(|x|) = 1/(1+e), sigmoid(-|x|) = e/(1+e).  The approximate EUP
    # reciprocal is refined with two Newton steps (pure VALU, free filler in a
    # memory-bound kernel) so full f32 accuracy is preserved.
    denom = 1.0 + e
    r = pl.reciprocal(denom, approx=True)
    r = r * (2.0 - denom * r)
    r = r * (2.0 - denom * r)
    is_pos = y == 1.0
    same_side = is_pos == (x >= 0.0)
    # 1 - pt = 1-sigmoid(x) if y==1 else sigmoid(x)  ==  e*r if same_side else r
    omp = jnp.where(same_side, e, 1.0) * r

    alpha_t = jnp.where(is_pos, alpha, 1.0 - alpha)

    g = float(gamma)
    if g.is_integer() and 0.0 <= g <= 8.0:
        gi = int(g)
        mod = jnp.ones_like(omp) if gi == 0 else omp
        for _ in range(max(gi - 1, 0)):
            mod = mod * omp            # VPU multiplies instead of EUP log+exp pow
    else:
        mod = omp ** g

    focal = alpha_t * mod * bce

    def _fold(v):
        # block_rows -> 8 sublanes with pure elementwise (vreg) adds; the
        # cross-lane reduce happens once in the wrapper on a tiny array.
        return v.reshape(block_rows // _SUB, _SUB, _LANE).sum(axis=0)

    if not ragged_last:
        out_ref[...] = _fold(focal)
    else:
        # Only the last grid block can contain rows past the end of the array
        # (Pallas pads the block read with unspecified values) -> mask them,
        # but only on that block; all other blocks take the cheap path.
        is_last = pl.program_id(0) == pl.num_programs(0) - 1

        @pl.when(jnp.logical_not(is_last))
        def _():
            out_ref[...] = _fold(focal)

        @pl.when(is_last)
        def _():
            row = lax.broadcasted_iota(jnp.int32, focal.shape, 0)
            out_ref[...] = _fold(jnp.where(row < rows_in_last, focal, 0.0))


def _focal_sum_jnp(x, y, pos_weight, gamma, alpha):
    # Plain-XLA path for the <128-element tail (or inputs too small for a tile).
    sp = jnp.maximum(-x, 0.0) + jnp.log1p(jnp.exp(-jnp.abs(x)))
    if pos_weight == 1.0:
        bce = (1.0 - y) * x + sp
    else:
        bce = (1.0 - y) * x + (pos_weight * y + (1.0 - y)) * sp
    p = jax.nn.sigmoid(x)
    pt = jnp.where(y == 1.0, p, 1.0 - p)
    at = jnp.where(y == 1.0, alpha, 1.0 - alpha)
    return jnp.sum(at * (1.0 - pt) ** gamma * bce)


def weighted_focal_loss(inputs, targets, pos_weight=None, gamma=3.0, alpha=0.75):
    """Pallas TPU equivalent of WeightedFocalLoss.forward -> scalar mean loss.

    Inputs are processed at their native dtype (f32/bf16 logits, float/int/bool
    targets) and upcast to f32 in VMEM; do NOT pre-cast in the caller.
    # TODO(synk): tensor-valued pos_weight (torch allows it); only a scalar here.
    """
    x = jnp.asarray(inputs).reshape(-1)      # == .view(-1, 1) semantics
    y = jnp.asarray(targets).reshape(-1)
    n = x.shape[0]
    pw = 1.0 if pos_weight is None else float(pos_weight)

    gran = max(_min_sublanes(x.dtype), _min_sublanes(y.dtype))
    rows_total = n // _LANE

    total = jnp.float32(0.0)
    tail_start = 0

    if rows_total >= gran:
        m = rows_total * _LANE
        # Lane-aligned prefix goes through the kernel with no pad copy; when
        # n % 128 == 0 the reshape is a pure metadata view of the input.
        xm = (x if m == n else x[:m]).reshape(rows_total, _LANE)
        ym = (y if m == n else y[:m]).reshape(rows_total, _LANE)

        # Largest tile that fits (<= 2048 rows), never larger than the data,
        # and split so there are >= 2 blocks when possible (the "parallel"
        # grid axis is what feeds both v7x TensorCores).
        block_rows = min(_MAX_BLOCK_ROWS,
                         _round_up(pl.cdiv(rows_total, 2), gran),
                         (rows_total // gran) * gran)
        num_blocks = pl.cdiv(rows_total, block_rows)
        rows_in_last = rows_total - (num_blocks - 1) * block_rows
        ragged_last = rows_in_last != block_rows

        kernel = functools.partial(
            _focal_kernel,
            gamma=float(gamma), alpha=float(alpha), pos_weight=pw,
            block_rows=int(block_rows), rows_in_last=int(rows_in_last),
            ragged_last=bool(ragged_last))

        partials = pl.pallas_call(
            kernel,
            out_shape=jax.ShapeDtypeStruct((num_blocks * _SUB, _LANE), jnp.float32),
            grid_spec=pltpu.PrefetchScalarGridSpec(
                num_scalar_prefetch=0,
                grid=(num_blocks,),
                in_specs=[
                    pl.BlockSpec((block_rows, _LANE), lambda i: (i, 0)),
                    pl.BlockSpec((block_rows, _LANE), lambda i: (i, 0)),
                ],
                out_specs=pl.BlockSpec((_SUB, _LANE), lambda i: (i, 0)),
            ),
            compiler_params=pltpu.CompilerParams(
                dimension_semantics=("parallel",)),
        )(xm, ym)
        total = total + jnp.sum(partials)
        tail_start = m

    if tail_start < n:
        xt = x[tail_start:].astype(jnp.float32)
        yt = y[tail_start:].astype(jnp.float32)
        total = total + _focal_sum_jnp(xt, yt, pw, gamma, alpha)

    return total / jnp.float32(n)


def _reference(inputs, targets, pos_weight=None, gamma=3.0, alpha=0.75):
    x = jnp.asarray(inputs, jnp.float32).reshape(-1, 1)
    y = jnp.asarray(targets, jnp.float32).reshape(-1, 1)
    pw = 1.0 if pos_weight is None else float(pos_weight)
    sp = jnp.maximum(-x, 0.0) + jnp.log1p(jnp.exp(-jnp.abs(x)))
    bce = (1.0 - y) * x + (pw * y + (1.0 - y)) * sp
    p = jax.nn.sigmoid(x)
    pt = jnp.where(y == 1.0, p, 1.0 - p)
    at = jnp.where(y == 1.0, alpha, 1.0 - alpha)
    return jnp.mean(at * (1.0 - pt) ** gamma * bce)


if __name__ == "__main__":
    key = jax.random.PRNGKey(0)
    k1, k2, k3, k4 = jax.random.split(key, 4)

    # (batch, seq) per-timestep logits from the LSTM ensemble.
    # 2*700 = 1400 elements exercises the multi-block kernel path, the ragged
    # last block (pl.when masked) and the <128-element jnp tail.
    batch, seq = 2, 700
    logits = jax.random.normal(k1, (batch, seq), dtype=jnp.float32) * 2.0
    targets = (jax.random.uniform(k2, (batch, seq)) > 0.7).astype(jnp.float32)

    loss = weighted_focal_loss(logits, targets, pos_weight=None,
                               gamma=3.0, alpha=0.75)
    loss = jax.block_until_ready(loss)
    ref = _reference(logits, targets, pos_weight=None, gamma=3.0, alpha=0.75)
    assert jnp.allclose(loss, ref, atol=1e-5, rtol=1e-5), (loss, ref)

    # pos_weight path on a lane-aligned size (no tail, non-ragged last block).
    batch2, seq2 = 4, 256
    logits2 = jax.random.normal(k3, (batch2, seq2), dtype=jnp.float32) * 2.0
    targets2 = (jax.random.uniform(k4, (batch2, seq2)) > 0.7).astype(jnp.float32)
    loss2 = weighted_focal_loss(logits2, targets2, pos_weight=2.0,
                                gamma=3.0, alpha=0.75)
    loss2 = jax.block_until_ready(loss2)
    ref2 = _reference(logits2, targets2, pos_weight=2.0, gamma=3.0, alpha=0.75)
    assert jnp.allclose(loss2, ref2, atol=1e-5, rtol=1e-5), (loss2, ref2)

    print("KERNEL_OK")
</pallas_src>

<mosaic_0001>
module attributes {stable_mosaic.version = 11 : i64} {
  func.func @_focal_kernel(%arg0: i32, %arg1: memref<8x128xf32, #tpu.memory_space<vmem>>, %arg2: memref<8x128xf32, #tpu.memory_space<vmem>>, %arg3: memref<8x128xf32, #tpu.memory_space<vmem>>) attributes {dimension_semantics = [#tpu.dimension_semantics<parallel>], iteration_bounds = array<i64: 2>, scalar_prefetch = 0 : i64, scratch_operands = 0 : i64, tpu.core_type = #tpu.core_type<tc>, window_params = [{transform_indices = @transform_0, window_bounds = array<i64: 8, 128>}, {transform_indices = @transform_1, window_bounds = array<i64: 8, 128>}, {transform_indices = @transform_2, window_bounds = array<i64: 8, 128>}]} {
    %c0 = arith.constant 0 : index
    %c0_0 = arith.constant 0 : index
    %0 = vector.load %arg1[%c0, %c0_0] : memref<8x128xf32, #tpu.memory_space<vmem>>, vector<8x128xf32>
    %c0_1 = arith.constant 0 : index
    %c0_2 = arith.constant 0 : index
    %1 = vector.load %arg2[%c0_1, %c0_2] : memref<8x128xf32, #tpu.memory_space<vmem>>, vector<8x128xf32>
    %2 = math.absf %0 : vector<8x128xf32>
    %cst = arith.constant 0.000000e+00 : f32
    %3 = vector.broadcast %cst : f32 to vector<8x128xf32>
    %4 = arith.subf %3, %2 : vector<8x128xf32>
    %5 = math.exp %4 : vector<8x128xf32>
    %cst_3 = arith.constant 0.000000e+00 : f32
    %6 = vector.broadcast %cst_3 : f32 to vector<8x128xf32>
    %7 = arith.subf %6, %0 : vector<8x128xf32>
    %cst_4 = arith.constant 0.000000e+00 : f32
    %8 = vector.broadcast %cst_4 : f32 to vector<8x128xf32>
    %9 = arith.maximumf %7, %8 : vector<8x128xf32>
    %10 = math.log1p %5 : vector<8x128xf32>
    %11 = arith.addf %9, %10 : vector<8x128xf32>
    %cst_5 = arith.constant 1.000000e+00 : f32
    %12 = vector.broadcast %cst_5 : f32 to vector<8x128xf32>
    %13 = arith.subf %12, %1 : vector<8x128xf32>
    %14 = arith.mulf %13, %0 : vector<8x128xf32>
    %15 = arith.addf %14, %11 : vector<8x128xf32>
    %cst_6 = arith.constant 1.000000e+00 : f32
    %16 = vector.broadcast %cst_6 : f32 to vector<8x128xf32>
    %17 = arith.addf %16, %5 : vector<8x128xf32>
    %18 = tpu.reciprocal %17 {approx = true} : vector<8x128xf32> -> vector<8x128xf32>
    %19 = arith.mulf %17, %18 : vector<8x128xf32>
    %cst_7 = arith.constant 2.000000e+00 : f32
    %20 = vector.broadcast %cst_7 : f32 to vector<8x128xf32>
    %21 = arith.subf %20, %19 : vector<8x128xf32>
    %22 = arith.mulf %18, %21 : vector<8x128xf32>
    %23 = arith.mulf %17, %22 : vector<8x128xf32>
    %cst_8 = arith.constant 2.000000e+00 : f32
    %24 = vector.broadcast %cst_8 : f32 to vector<8x128xf32>
    %25 = arith.subf %24, %23 : vector<8x128xf32>
    %26 = arith.mulf %22, %25 : vector<8x128xf32>
    %cst_9 = arith.constant 1.000000e+00 : f32
    %27 = vector.broadcast %cst_9 : f32 to vector<8x128xf32>
    %28 = arith.cmpf oeq, %1, %27 : vector<8x128xf32>
    %cst_10 = arith.constant 0.000000e+00 : f32
    %29 = vector.broadcast %cst_10 : f32 to vector<8x128xf32>
    %30 = arith.cmpf oge, %0, %29 : vector<8x128xf32>
    %31 = arith.xori %28, %30 : vector<8x128xi1>
    %cst_11 = arith.constant dense<true> : vector<8x128xi1>
    %32 = arith.xori %31, %cst_11 : vector<8x128xi1>
    %cst_12 = arith.constant 1.000000e+00 : f32
    %33 = vector.broadcast %cst_12 : f32 to vector<8x128xf32>
    %34 = arith.select %32, %5, %33 : vector<8x128xi1>, vector<8x128xf32>
    %35 = arith.mulf %34, %26 : vector<8x128xf32>
    %cst_13 = arith.constant 7.500000e-01 : f32
    %cst_14 = arith.constant 2.500000e-01 : f32
    %36 = vector.broadcast %cst_13 : f32 to vector<8x128xf32>
    %37 = vector.broadcast %cst_14 : f32 to vector<8x128xf32>
    %38 = arith.select %28, %36, %37 : vector<8x128xi1>, vector<8x128xf32>
    %39 = arith.mulf %35, %35 : vector<8x128xf32>
    %40 = arith.mulf %39, %35 : vector<8x128xf32>
    %41 = arith.mulf %38, %40 : vector<8x128xf32>
    %42 = arith.mulf %41, %15 : vector<8x128xf32>
    %c1_i32 = arith.constant 1 : i32
    %43 = arith.cmpi eq, %arg0, %c1_i32 : i32
    %true = arith.constant true
    %44 = arith.xori %43, %true : i1
    %45 = arith.extui %44 : i1 to i32
    %c0_i32 = arith.constant 0 : i32
    %46 = arith.cmpi ne, %45, %c0_i32 : i32
    scf.if %46 {
      %49 = vector.shape_cast %42 : vector<8x128xf32> to vector<1x8x128xf32>
      %cst_16 = arith.constant dense<0.000000e+00> : vector<8x128xf32>
      %50 = vector.multi_reduction <add>, %49, %cst_16 [0] : vector<1x8x128xf32> to vector<8x128xf32>
      %c0_17 = arith.constant 0 : index
      %c0_18 = arith.constant 0 : index
      %51 = vector.load %arg3[%c0_17, %c0_18] : memref<8x128xf32, #tpu.memory_space<vmem>>, vector<8x128xf32>
      tpu.vector_store %arg3[%c0_17, %c0_18], %50 {strides = array<i32>} : memref<8x128xf32, #tpu.memory_space<vmem>>, vector<8x128xf32>,
    } else {
    }
    %47 = arith.extui %43 : i1 to i32
    %c0_i32_15 = arith.constant 0 : i32
    %48 = arith.cmpi ne, %47, %c0_i32_15 : i32
    scf.if %48 {
      %49 = tpu.iota {dimensions = array<i32: 0>} : vector<8x128xi32>
      %c2_i32 = arith.constant 2 : i32
      %50 = vector.broadcast %c2_i32 : i32 to vector<8x128xi32>
      %51 = arith.cmpi slt, %49, %50 : vector<8x128xi32>
      %cst_16 = arith.constant 0.000000e+00 : f32
      %52 = vector.broadcast %cst_16 : f32 to vector<8x128xf32>
      %53 = arith.select %51, %42, %52 : vector<8x128xi1>, vector<8x128xf32>
      %54 = vector.shape_cast %53 : vector<8x128xf32> to vector<1x8x128xf32>
      %cst_17 = arith.constant dense<0.000000e+00> : vector<8x128xf32>
      %55 = vector.multi_reduction <add>, %54, %cst_17 [0] : vector<1x8x128xf32> to vector<8x128xf32>
      %c0_18 = arith.constant 0 : index
      %c0_19 = arith.constant 0 : index
      %56 = vector.load %arg3[%c0_18, %c0_19] : memref<8x128xf32, #tpu.memory_space<vmem>>, vector<8x128xf32>
      tpu.vector_store %arg3[%c0_18, %c0_19], %55 {strides = array<i32>} : memref<8x128xf32, #tpu.memory_space<vmem>>, vector<8x128xf32>,
    } else {
    }
    return
  }
  func.func @transform_0(%arg0: i32) -> (i32, i32) {
    %c0_i32 = arith.constant 0 : i32
    %c0_i32_0 = arith.constant 0 : i32
    return %arg0, %c0_i32 : i32, i32
  }
  func.func @transform_1(%arg0: i32) -> (i32, i32) {
    %c0_i32 = arith.constant 0 : i32
    %c0_i32_0 = arith.constant 0 : i32
    return %arg0, %c0_i32 : i32, i32
  }
  func.func @transform_2(%arg0: i32) -> (i32, i32) {
    %c0_i32 = arith.constant 0 : i32
    %c0_i32_0 = arith.constant 0 : i32
    return %arg0, %c0_i32 : i32, i32
  }
}

</mosaic_0001>

<bundles_post_ra>
// kernel: tpu_custom_call.1
= control target key start
LH: loop header
LB: loop body
LE: loop exit
PB: predicated region body
PF: predicated region fallthrough
CT: control target
= control target key end

     0   :  { %7 = vsyncpa [#allocation3], 0  ;;  %s787_s0 = inlined_call_operand.hbm [shape: f32[10,128], index: 0, kind: input, shape index: {}]   ;;  %s788_s1 = inlined_call_operand.hbm [shape: f32[10,128], index: 1, kind: input, shape index: {}]   ;;  %s789_s2 = inlined_call_operand.hbm [shape: f32[16,128], index: 2, kind: output, shape index: {}]  }
   0x1   :  { %9 = vsyncpa [#allocation3 + $0x1], 0 }
   0x2   :  { %10 = vsyncpa [#allocation6], 0 }
   0x3   :  { %12 = vsyncpa [#allocation6 + $0x1], 0 }
   0x4   :  { %13 = vsyncpa [#allocation4], 0 }
   0x5   :  { %15 = vsyncpa [#allocation4 + $0x1], 0  ;;  %s581_s9 = smov 0   ;;  %s583_s10 = smov 0  }
   0x6   :  { %s585_s11 = smov 0   ;;  %s587_s12 = smov 0  }
   0x7 LB: > { %s602_s13 = sadd.s32 4294967295, %s559_s12   ;;  %s359_s14 = sadd.s32 4294967294, %s559_s12   ;;  %s559_s12 = sphi %s587_s12, %s810_s12   ;;  %s555_s11 = sphi %s585_s11, %s809_s11   ;;  %s551_s10 = sphi %s583_s10, %s808_s10   ;;  %s547_s9 = sphi %s581_s9, %s807_s9  }
   0x8   : > { %s606_s15 = sadd.s32 1, %s559_s12   ;;  %s28_s16 = sadd.s32 1, %s555_s11 }
   0x9   : > { %s25_s17 = ssub.s32 %s559_s12, %s606_s15  ;;  %p35_p0 = scmp.ne.s32.totalorder %s555_s11, %s551_s10 }
   0xa   : > { %p26_p1 = scmp.eq.s32.totalorder %s25_s17, 0  ;;  %p36_p2 = scmp.eq.s32.totalorder %s559_s12, 0 }
   0xb   : > { %p41_p3 = scmp.ne.s32.totalorder %s551_s10, %s547_s9  ;;  %p42_p4 = scmp.eq.s32.totalorder %s602_s13, 0 }
   0xc   : > { %s618_s18 = scalar_select %p26_p1, %s555_s11, %s28_s16  }
   0xd   : > { %p620_p5 = por %p36_p2, %p35_p0  ;;  %p624_p6 = por %p42_p4, %p41_p3 }
   0xe   : > { %p790_p7 = scmp.eq.s32.totalorder %s602_s13, 1  ;;  %p97_p8 = scmp.eq.s32.totalorder %s359_s14, 1 }
   0xf   : > { %s794_s20 = scalar_select %p624_p6, 1, 0 }
  0x10   : > { %p393_p10 = scmp.lt.s32.totalorder %s559_s12, 2  ;;  %p633_p11 = por %p790_p7, %p35_p0 }
  0x11   : > { %p637_p12 = por %p97_p8, %p41_p3  ;;  %s642_s23 = sand.u32 1, %s555_s11  }
  0x12   : > { %s795_s21 = scalar_select %p633_p11, 1, 0 }
  0x13   : > { %s796_s22 = scalar_select %p637_p12, 1, 0 }
  0x14   : > { %s363_s24 = sshll.u32 %s559_s12, 7  ;;  %s362_s25 = sshll.u32 %s642_s23, 3 }
  0x15   : > { %s651_s28 = scalar_lea.hbm %s787_s0, %s363_s24  ;;  %s121_s29 = scalar_lea.vmem [#allocation2], %s362_s25 }
  0x16   : > { %s128_s30 = sshll.u32 %s121_s29, 4  ;;  %p657_p13 = pnand %p393_p10, %p620_p5  ;;  %s661_s30 = int_to_ptr.vmem [resolvable:$true] %s128_s30 }
  0x17   : > { %s118_s4 = scalar_lea.sflag [#allocation3], %s642_s23  ;;  %s435_s5 = scalar_lea.hbm %s651_s28, 128 }
  0x18   : > { %p436_p2 = scmp.ne.s32.totalorder %s651_s28, %s435_s5  ;;  %p437_p3 = pneg %p657_p13 }
  0x19   : > { %s440_s8 = scalar_lea.hbm %s787_s0, 256  ;;  %p441_p5 = scmp.lt.s32.totalorder %s651_s28, %s787_s0 }
  0x1a   : > { %p438_p4 = pnand %p437_p3, %p436_p2  ;;  %p442_p10 = scmp.lt.s32.totalorder %s440_s8, %s435_s5 }
  0x1c   : > { %p439_p8 = pneg %p438_p4  ;;  %p443_p9 = por %p442_p10, %p441_p5 }
  0x1e   : > { %p444_p7 = pnand %p443_p9, %p439_p8 }
  0x20   : > { %447 = shalt.err (!%p444_p7)
}
  0x21   : > { %s448_s17 = scalar_lea.vmem %s661_s30, 128  ;;  %s561_s19 = smov [#allocation2]  }
  0x22   : > { %p449_p0 = scmp.ne.s32.totalorder %s661_s30, %s448_s17  ;;  %s453_s26 = sshll.u32 %s561_s19, 4  ;;  %s454_s26 = int_to_ptr.vmem [resolvable:$false] %s453_s26 }
  0x23   : > { %s455_s27 = scalar_lea.vmem %s454_s26, 256  ;;  %p456_p1 = scmp.lt.s32.totalorder %s661_s30, %s454_s26 }
  0x24   : > { %p451_p2 = pnand %p449_p0, %p437_p3  ;;  %p457_p12 = scmp.lt.s32.totalorder %s455_s27, %s448_s17 }
  0x26   : > { %p452_p4 = pneg %p451_p2  ;;  %p458_p11 = por %p457_p12, %p456_p1 }
  0x28   : > { %p459_p5 = pnand %p458_p11, %p452_p4 }
  0x2a   : > { %462 = shalt.err (!%p459_p5)
}
  0x2b   : > { %385 = dma.hbm_to_vmem [thread:$0]  (!%p657_p13), %s651_s28, 128, %s661_s30, %s118_s4  }
  0x2c   : > { %p798_p7 = scmp.lt.s32.totalorder %s559_s12, 3  ;;  %p799_p9 = scmp.ge.s32.totalorder %s559_s12, 1 }
  0x2d   : > { %s703_s7 = scalar_lea.hbm %s788_s1, %s363_s24  ;;  %s139_s8 = scalar_lea.vmem [#allocation5], %s362_s25 }
  0x2e   : > { %p694_p0 = pnand %p799_p9, %p798_p7  ;;  %s146_s14 = sshll.u32 %s139_s8, 4  ;;  %s147_s14 = int_to_ptr.vmem [resolvable:$true] %s146_s14 }
  0x2f   : > { %s136_s28 = scalar_lea.sflag [#allocation6], %s642_s23  ;;  %s463_s30 = scalar_lea.hbm %s703_s7, 128 }
  0x30   : > { %s800_s29 = scalar_select %p694_p0, 1, 0 }
  0x31   : > { %p464_p11 = scmp.ne.s32.totalorder %s703_s7, %s463_s30  ;;  %s468_s17 = scalar_lea.hbm %s788_s1, 256 }
  0x32   : > { %p469_p8 = scmp.lt.s32.totalorder %s703_s7, %s788_s1  ;;  %p470_p10 = scmp.lt.s32.totalorder %s468_s17, %s463_s30 }
  0x33   : > { %p466_p12 = pnand %p464_p11, %p437_p3 }
  0x34   : > { %p471_p2 = por %p470_p10, %p469_p8 }
  0x35   : > { %p467_p1 = pneg %p466_p12 }
  0x37   : > { %p472_p4 = pnand %p471_p2, %p467_p1 }
  0x39   : > { %475 = shalt.err (!%p472_p4)
}
  0x3a   : > { %s476_s25 = scalar_lea.vmem %s147_s14, 128  ;;  %s562_s23 = smov [#allocation5]  }
  0x3b   : > { %p477_p5 = scmp.ne.s32.totalorder %s147_s14, %s476_s25  ;;  %s481_s26 = sshll.u32 %s562_s23, 4  ;;  %s482_s26 = int_to_ptr.vmem [resolvable:$false] %s481_s26 }
  0x3c   : > { %s483_s27 = scalar_lea.vmem %s482_s26, 256  ;;  %p484_p11 = scmp.lt.s32.totalorder %s147_s14, %s482_s26 }
  0x3d   : > { %p479_p7 = pnand %p477_p5, %p437_p3  ;;  %p485_p12 = scmp.lt.s32.totalorder %s483_s27, %s476_s25 }
  0x3f   : > { %p480_p9 = pneg %p479_p7  ;;  %p486_p6 = por %p485_p12, %p484_p11 }
  0x41   : > { %p487_p0 = pnand %p486_p6, %p480_p9 }
  0x43   : > { %490 = shalt.err (!%p487_p0)
}
  0x44   : > { %388 = dma.hbm_to_vmem [thread:$0]  (!%p657_p13), %s703_s7, 128, %s147_s14, %s136_s28  }
  0x45   : > { %p801_p1 = scmp.ne.s32.totalorder %s800_s29, 0 }
  0x46   : > { %s729_s5 = sand.u32 (!%p801_p1), 1, %s551_s10   ;;  %p802_p6 = scmp.ne.s32.totalorder (!%p801_p1), %s794_s20, 0 }
  0x47   : > { %155 = sbr.rel (%p801_p1) target bundleno = 177 (0xb1), region = 28  ;;  %s732_s6 = sshll.u32 (!%p801_p1), %s729_s5, 3 }
  0x48   : > { %s158_s8 = scalar_lea.sflag (!%p801_p1), [#allocation3], %s729_s5  ;;  %s161_s30 = scalar_lea.vmem (!%p801_p1), [#allocation2], %s732_s6 }
  0x4c   : > { %534 = dma.done.wait (%p802_p6), %s158_s8, 128  }
  0x4d   : > { %536 = vsyncadd (%p802_p6), %s158_s8, 4294967168  ;;  %s167_s3 = scalar_lea.sflag [#allocation6], %s729_s5  ;;  %s170_s29 = scalar_lea.vmem [#allocation5], %s732_s6 }
  0x4e   : > { %538 = dma.done.wait (%p802_p6), %s167_s3, 128  }
  0x4f   : > { %540 = vsyncadd (%p802_p6), %s167_s3, 4294967168  ;;  %v196_v0 = vld [vmem:[%s161_s30] sm:$0xff]  ;;  %v197_v6 = vld [vmem:[%s170_s29] sm:$0xff]  ;;  %vm563_vm4 = vmmov 1   ;;  %v564_v29 = vmov 0.25   ;;  %s195_s20 = scalar_lea.vmem [#allocation7], %s732_s6 }
  0x50   : > { %v198_v1 = vand.u32 2147483647, %v196_v0  ;;  %vm225_vm0 = vcmp.eq.f32.partialorder %v197_v6, 1.0  ;;  %vm226_vm1 = vcmp.ge.f32.partialorder %v196_v0, 0.0  ;;  %v202_v14 = vsub.f32 0.0, %v196_v0  ;;  %p803_p13 = scmp.eq.s32.totalorder %s602_s13, 1 }
  0x51   : > { %vm227_vm2 = vmxor %vm225_vm0, %vm226_vm1  ;;  %v214_v20 = vsub.f32 1.0, %v197_v6  ;;  %v231_v30 = vsel %vm225_vm0, 0.75, %v564_v29 }
  0x52   : > { %v199_v2 = vsub.f32 0.0, %v198_v1  ;;  %vm228_vm5 = vmxor %vm227_vm2, %vm563_vm4  ;;  %v203_v19 = vmax.f32 %v202_v14, 0.0 }
  0x53   : > { %v215_v26 = vmul.f32 %v214_v20, %v196_v0 }
  0x54   : > { %v200_v3 = vmul.f32 1.442695, %v199_v2 }
  0x56   : > { %429 = vpow2.f32 %v200_v3 }
  0x63   : > { %v430_v4 = vpop.eup %429 }
  0x64   : > { %v204_v5 = vadd.f32 1.0, %v430_v4  ;;  %v207_v7 = vmul.f32 -0.5, %v430_v4  ;;  %v210_v12 = vand.u32 2147483647, %v430_v4  ;;  %v229_v23 = vsel %vm228_vm5, %v430_v4, 1.0 }
  0x66   : > { %431 = vrcp.f32 %v204_v5  ;;  %v208_v10 = vadd.f32 1.0, %v207_v7  ;;  %vm211_vm3 = vcmp.lt.f32.partialorder %v210_v12, 0.0004427343 }
  0x67   : > { %433 = vlog2.f32 %v204_v5 }
  0x68   : > { %v209_v17 = vmul.f32 %v430_v4, %v208_v10 }
  0x73   : > { %v432_v8 = vpop.eup %431 }
  0x74   : > { %v219_v9 = vmul.f32 %v432_v8, %v204_v5  ;;  %v434_v11 = vpop.eup %433 }
  0x75   : > { %v206_v16 = vmul.f32 0.6931472, %v434_v11 }
  0x76   : > { %v220_v13 = vsub.f32 2.0, %v219_v9 }
  0x77   : > { %v212_v22 = vsel %vm211_vm3, %v209_v17, %v206_v16 }
  0x78   : > { %v221_v15 = vmul.f32 %v432_v8, %v220_v13  ;;  %v213_v25 = vadd.f32 %v212_v22, %v203_v19 }
  0x7a   : > { %v222_v18 = vmul.f32 %v221_v15, %v204_v5  ;;  %v216_v31 = vadd.f32 %v215_v26, %v213_v25 }
  0x7c   : > { %v223_v21 = vsub.f32 2.0, %v222_v18 }
  0x7e   : > { %v224_v24 = vmul.f32 %v223_v21, %v221_v15 }
  0x80   : > { %v230_v27 = vmul.f32 %v229_v23, %v224_v24 }
  0x82   : > { %v232_v28 = vmul.f32 %v230_v27, %v230_v27 }
  0x84   : > { %v233_v32 = vmul.f32 %v232_v28, %v230_v27  ;;  %240 = sbr.rel (%p803_p13) target bundleno = 139 (0x8b), region = 40 }
  0x86   : > { %v234_v33 = vmul.f32 %v233_v32, %v231_v30 }
  0x88   : > { %v235_v34 = vmul.f32 %v234_v33, %v216_v31 }
  0x8a   : > { %242 = vst [vmem:[%s195_s20] sm:$0xff] %v235_v34 }
  0x8b PF: > { %p371_p3 = scmp.ne.s32.totalorder %s602_s13, 1 }
  0x8d   : > { %245 = sbr.rel (%p371_p3) target bundleno = 153 (0x99), region = 44 }
  0x92   : > { %v246_v35 = vlaneseq }
  0x94   : > { %v247_v36 = vshrl.u32 %v246_v35, 7 }
  0x96   : > { %vm248_vm6 = vcmp.lt.s32.totalorder %v247_v36, 2 }
  0x97   : > { %v249_v37 = vsel %vm248_vm6, %v235_v34, 0.0 }
  0x98   : > { %251 = vst [vmem:[%s195_s20] sm:$0xff] %v249_v37 }
  0x99 PF: > { %s373_s7 = sshll.u32 %s602_s13, 7  ;;  %s266_s16 = sshll.u32 %s195_s20, 4  ;;  %s267_s16 = int_to_ptr.vmem [resolvable:$true] %s266_s16 }
  0x9a   : > { %s264_s4 = scalar_lea.hbm %s789_s2, %s373_s7  ;;  %s253_s17 = scalar_lea.sflag [#allocation4], %s729_s5 }
  0x9b   : > { %s491_s24 = scalar_lea.vmem %s267_s16, 128  ;;  %p804_p8 = scmp.ne.s32.totalorder %s795_s21, 0 }
  0x9c   : > { %p492_p0 = scmp.ne.s32.totalorder %s267_s16, %s491_s24  ;;  %s565_s19 = smov [#allocation7]  }
  0x9d   : > { %s495_s25 = sshll.u32 %s565_s19, 4  ;;  %s496_s25 = int_to_ptr.vmem [resolvable:$false] %s495_s25 }
  0x9e   : > { %p493_p10 = pnand %p492_p0, %p804_p8  ;;  %s497_s23 = scalar_lea.vmem %s496_s25, 256 }
  0x9f   : > { %p498_p4 = scmp.lt.s32.totalorder %s267_s16, %s496_s25  ;;  %p499_p5 = scmp.lt.s32.totalorder %s497_s23, %s491_s24 }
  0xa0   : > { %p494_p2 = pneg %p493_p10 }
  0xa1   : > { %p500_p7 = por %p499_p5, %p498_p4 }
  0xa3   : > { %p501_p9 = pnand %p500_p7, %p494_p2 }
  0xa5   : > { %504 = shalt.err (!%p501_p9)
}
  0xa6   : > { %s505_s13 = scalar_lea.hbm %s264_s4, 128  ;;  %s509_s5 = scalar_lea.hbm %s789_s2, 256 }
  0xa7   : > { %p506_p11 = scmp.ne.s32.totalorder %s264_s4, %s505_s13  ;;  %p510_p6 = scmp.lt.s32.totalorder %s264_s4, %s789_s2 }
  0xa8   : > { %p511_p13 = scmp.lt.s32.totalorder %s509_s5, %s505_s13 }
  0xa9   : > { %p507_p12 = pnand %p506_p11, %p804_p8 }
  0xaa   : > { %p512_p3 = por %p511_p13, %p510_p6 }
  0xab   : > { %p508_p1 = pneg %p507_p12 }
  0xad   : > { %p513_p0 = pnand %p512_p3, %p508_p1 }
  0xaf   : > { %516 = shalt.err (!%p513_p0)
}
  0xb0   : > { %380 = dma.vmem_to_hbm [thread:$0]  (%p804_p8), %s267_s16, 128, %s264_s4, %s253_s17  }
  0xb1 PF: > { %s278_s30 = sand.u32 1, %s547_s9   ;;  %p805_p10 = scmp.ne.s32.totalorder %s796_s22, 0 }
  0xb2   : > { %p806_p2 = scmp.ge.s32.totalorder %s559_s12, 2  ;;  %s279_s3 = scalar_lea.sflag [#allocation4], %s278_s30 }
  0xb4   : > { %p390_p4 = pnand %p806_p2, %p805_p10 }
  0xb6   : > { %p391_p5 = pneg %p390_p4 }
  0xb8   : > { %542 = dma.done.wait (%p391_p5), %s279_s3, 128  }
  0xb9   : > { %544 = vsyncadd (%p391_p5), %s279_s3, 4294967168  ;;  %p18_p7 = scmp.ge.s32.totalorder %s606_s15, 4   ;;  %s807_s9 = smov %s551_s10 }
  0xba   : > { %s808_s10 = smov %s555_s11  ;;  %s809_s11 = smov %s618_s18 }
  0xbb   : > { %s810_s12 = smov %s606_s15  ;;  %20 = sbr.rel (!%p18_p7) target bundleno = 7 (0x7), region = 94 }
  0xc0   :  { %284 = vsyncpa [#allocation3], 1 }
  0xc1   :  { %286 = vsyncpa [#allocation3 + $0x1], 1 }
  0xc2   :  { %287 = vsyncpa [#allocation6], 1 }
  0xc3   :  { %289 = vsyncpa [#allocation6 + $0x1], 1 }
  0xc4   :  { %290 = vsyncpa [#allocation4], 1 }
  0xc5   :  { %292 = vsyncpa [#allocation4 + $0x1], 1 }

</bundles_post_ra>
